<compile_context>
chip_gen: v7x
topology: tpu7x:2x2x1
jax: 0.10.0
libtpu: 0.0.40
codegen_flags: <defaults>
</compile_context>

<pallas_src>
import functools

import jax
import jax.numpy as jnp
from jax.experimental import pallas as pl
from jax.experimental.pallas import tpu as pltpu

SMOOTHING = 0.1  # matches module default


@functools.lru_cache(maxsize=1)
def _tpu_info():
    """Returns (vmem_capacity_bytes, is_v7x, supports_bf16_math) with safe fallbacks."""
    kind = ""
    try:
        kind = jax.devices()[0].device_kind.lower()
    except Exception:
        kind = ""
    vmem_cap = None
    try:
        vmem_cap = int(getattr(pltpu.get_tpu_info(), "vmem_capacity_bytes"))
    except Exception:
        vmem_cap = None
    is_v7 = "v7" in kind
    # bf16 VALU/EUP exist on v6e and v7x; v5e and older keep the f32 path.
    supports_bf16_math = ("v6" in kind) or ("v7" in kind)
    if vmem_cap is None or vmem_cap <= 0:
        if ("v5e" in kind) or ("v5 lite" in kind) or ("v6" in kind):
            vmem_cap = 128 * 1024 * 1024
        else:
            vmem_cap = 64 * 1024 * 1024  # conservative (covers v7x / unknown)
    return vmem_cap, is_v7, supports_bf16_math


def _label_smoothing_kernel(preds_ref, target_ref, out_ref, *, total_rows, bf16_math):
    tb, c = preds_ref.shape
    i = pl.program_id(0)

    xr = preds_ref[...]  # native dtype (f32 or bf16)

    # Row-validity mask: the last batch tile may be partial.  Reductions run
    # over (possibly garbage) padded rows first; invalid rows are zeroed via
    # select afterwards (NaN/Inf in the unselected branch does not propagate).
    row_ids = i * tb + jax.lax.broadcasted_iota(jnp.int32, (tb, 1), 0)
    valid = row_ids < total_rows  # (TB, 1) bool

    # Single f32 upcast of the tile, reused by the f32 reductions below.
    x32 = xr.astype(jnp.float32)

    # Stable per-row logsumexp; log_softmax itself is never materialized:
    #   -sum_c log_softmax(x) = C * lse - sum_c x
    #   -log_softmax(x)[t]    = lse - x[t]
    if bf16_math and xr.dtype == jnp.bfloat16:
        # v6e/v7x fast path: bf16 VALU max/sub + bf16 EUP exp.
        # Accumulations (sum exp, lse, sums of x) stay in f32.
        m_n = jnp.max(xr, axis=-1, keepdims=True)              # (TB, 1) bf16
        sum_e = jnp.sum(jnp.exp(xr - m_n).astype(jnp.float32),
                        axis=-1, keepdims=True)                # f32 accumulate
        m = m_n.astype(jnp.float32)
    else:
        m = jnp.max(x32, axis=-1, keepdims=True)               # (TB, 1) f32
        sum_e = jnp.sum(jnp.exp(x32 - m), axis=-1, keepdims=True)
    lse = m + jnp.log(sum_e)                                   # (TB, 1) f32

    sum_x = jnp.sum(x32, axis=-1, keepdims=True)
    smooth_row = c * lse - sum_x                               # (TB, 1)

    tgt = target_ref[...]                                      # (TB, 1) int32
    col_ids = jax.lax.broadcasted_iota(jnp.int32, (tb, c), 1)
    x_tgt = jnp.sum(jnp.where(col_ids == tgt, x32, 0.0), axis=-1, keepdims=True)
    nll_row = lse - x_tgt                                      # (TB, 1)

    smooth_sum = jnp.sum(jnp.where(valid, smooth_row, 0.0))
    nll_sum = jnp.sum(jnp.where(valid, nll_row, 0.0))

    # Lane-padded per-tile partials: [0, 0, 0] = smooth sum, [0, 0, 1] = nll sum.
    sub = jax.lax.broadcasted_iota(jnp.int32, (1, 8, 128), 1)
    lane = jax.lax.broadcasted_iota(jnp.int32, (1, 8, 128), 2)
    out_ref[...] = jnp.where(
        (sub == 0) & (lane == 0), smooth_sum,
        jnp.where((sub == 0) & (lane == 1), nll_sum, 0.0))


def _choose_tile_b(batch, n_classes, itemsize, vmem_limit_bytes, min_tiles):
    """Rows per grid step, byte-budgeted (no artificial row cap).

    VMEM accounting per logit element:
      2 * itemsize   double-buffered input DMA (native dtype)
      ~5 * 4 bytes   live f32 temporaries in the body (upcast x, exp(x - m),
                     col-id iota, one-hot select, slack)
    ~60% of the scoped-VMEM limit goes to the logits tile; the rest is headroom
    for the target/partials buffers and compiler scratch.
    """
    bytes_per_elem = 2 * itemsize + 5 * 4
    usable = (vmem_limit_bytes * 3) // 5
    rows = usable // max(1, n_classes * bytes_per_elem)
    rows = max(8, (rows // 8) * 8)  # sublane-aligned; bytes-only cap
    if min_tiles > 1 and batch >= 8 * min_tiles:
        # v7x: force >= min_tiles grid steps so the "parallel" batch axis
        # actually shards across both TensorCores.
        rows = min(rows, max(8, (int(pl.cdiv(batch, min_tiles)) // 8) * 8))
    return batch if batch <= rows else rows


def label_smoothing_loss(preds, target, smoothing=SMOOTHING, tile_b=None,
                         bf16_math=None):
    """preds: (B, C) float logits (f32 or bf16), target: (B,) int class ids."""
    b, c = preds.shape
    vmem_cap, is_v7, hw_bf16 = _tpu_info()

    # 3/4 of physical VMEM, capped at 96 MiB: 96 MiB on v5e/v6e (128 MiB
    # physical) and 48 MiB on v7x (64 MiB physical per TensorCore).
    vmem_limit = max(32 * 1024 * 1024,
                     min((vmem_cap * 3) // 4, 96 * 1024 * 1024))

    if bf16_math is None:
        bf16_math = hw_bf16  # v6e/v7x only; v5e has no bf16 VPU/EUP
    use_bf16_math = bool(bf16_math) and preds.dtype == jnp.bfloat16

    if tile_b is None:
        tile_b = _choose_tile_b(b, c, preds.dtype.itemsize, vmem_limit,
                                min_tiles=2 if is_v7 else 1)
    num_tiles = int(pl.cdiv(b, tile_b))
    tgt2d = target.astype(jnp.int32).reshape(b, 1)

    kernel = functools.partial(_label_smoothing_kernel, total_rows=b,
                               bf16_math=use_bf16_math)
    partials = pl.pallas_call(
        kernel,
        out_shape=jax.ShapeDtypeStruct((num_tiles, 8, 128), jnp.float32),
        grid=(num_tiles,),
        in_specs=[
            pl.BlockSpec((tile_b, c), lambda i: (i, 0)),   # logits (native dtype)
            pl.BlockSpec((tile_b, 1), lambda i: (i, 0)),   # targets
        ],
        out_specs=pl.BlockSpec((1, 8, 128), lambda i: (i, 0, 0)),
        compiler_params=pltpu.CompilerParams(
            dimension_semantics=("parallel",),             # both TCs on v7x
            vmem_limit_bytes=int(vmem_limit),
        ),
        cost_estimate=pl.CostEstimate(
            flops=6 * b * c,
            transcendentals=b * c + b,
            bytes_accessed=b * c * preds.dtype.itemsize + b * 4
                           + num_tiles * 8 * 128 * 4,
        ),
    )(preds, tgt2d)

    # Tiny final reduction + normalization in plain JAX (divide once, by true B/C).
    smooth_total = jnp.sum(partials[:, 0, 0])
    nll_total = jnp.sum(partials[:, 0, 1])
    loss = smooth_total / b
    nll = nll_total / b
    return smoothing * (loss / c) + (1.0 - smoothing) * nll


def _reference(preds, target, smoothing=SMOOTHING):
    x = preds.astype(jnp.float32)
    log_preds = jax.nn.log_softmax(x, axis=-1)
    n = x.shape[-1]
    loss = jnp.mean(-jnp.sum(log_preds, axis=-1))
    nll = jnp.mean(
        -jnp.take_along_axis(log_preds, target.astype(jnp.int32)[:, None], axis=-1)[:, 0])
    return smoothing * (loss / n) + (1.0 - smoothing) * nll


if __name__ == "__main__":
    key = jax.random.PRNGKey(0)

    # Test 1: small f32 case.
    k1, k2, key = jax.random.split(key, 3)
    B, C = 8, 32
    preds = jax.random.normal(k1, (B, C), dtype=jnp.float32)
    target = jax.random.randint(k2, (B,), 0, C, dtype=jnp.int32)
    out = jax.block_until_ready(label_smoothing_loss(preds, target))
    ref = _reference(preds, target)
    assert jnp.allclose(out, ref, atol=1e-5, rtol=1e-5), (out, ref)

    # Test 2: multi-tile grid with a partial last batch tile (exercises masking).
    k1, k2, key = jax.random.split(key, 3)
    B2, C2 = 20, 32
    preds2 = jax.random.normal(k1, (B2, C2), dtype=jnp.float32)
    target2 = jax.random.randint(k2, (B2,), 0, C2, dtype=jnp.int32)
    out2 = jax.block_until_ready(label_smoothing_loss(preds2, target2, tile_b=8))
    ref2 = _reference(preds2, target2)
    assert jnp.allclose(out2, ref2, atol=1e-5, rtol=1e-5), (out2, ref2)

    # Test 3: bf16 logits, f32 in-kernel math forced (tight tolerance).
    k1, k2, key = jax.random.split(key, 3)
    B3, C3 = 16, 128
    preds3 = jax.random.normal(k1, (B3, C3), dtype=jnp.float32).astype(jnp.bfloat16)
    target3 = jax.random.randint(k2, (B3,), 0, C3, dtype=jnp.int32)
    out3 = jax.block_until_ready(
        label_smoothing_loss(preds3, target3, bf16_math=False))
    ref3 = _reference(preds3, target3)
    assert jnp.allclose(out3, ref3, atol=1e-3, rtol=1e-4), (out3, ref3)

    # Test 4: bf16 logits, default path (bf16 VALU/EUP math on v6e/v7x, f32 on
    # v5e).  Looser tolerance: the reference does the exp in f32.
    out4 = jax.block_until_ready(label_smoothing_loss(preds3, target3))
    assert jnp.allclose(out4, ref3, atol=2e-2, rtol=1e-2), (out4, ref3)

    print("KERNEL_OK")
</pallas_src>

<mosaic_0001>
module attributes {stable_mosaic.version = 11 : i64} {
  func.func @_label_smoothing_kernel(%arg0: i32, %arg1: memref<8x32xf32, #tpu.memory_space<vmem>>, %arg2: memref<8x1xi32, #tpu.memory_space<vmem>>, %arg3: memref<1x8x128xf32, #tpu.memory_space<vmem>>) attributes {dimension_semantics = [#tpu.dimension_semantics<parallel>], iteration_bounds = array<i64: 1>, scalar_prefetch = 0 : i64, scratch_operands = 0 : i64, tpu.core_type = #tpu.core_type<tc>, window_params = [{transform_indices = @transform_0, window_bounds = array<i64: 8, 32>}, {transform_indices = @transform_1, window_bounds = array<i64: 8, 1>}, {transform_indices = @transform_2, window_bounds = array<i64: 1, 8, 128>}]} {
    %c0 = arith.constant 0 : index
    %c0_0 = arith.constant 0 : index
    %0 = vector.load %arg1[%c0, %c0_0] : memref<8x32xf32, #tpu.memory_space<vmem>>, vector<8x32xf32>
    %c8_i32 = arith.constant 8 : i32
    %1 = arith.muli %arg0, %c8_i32 : i32
    %2 = tpu.iota {dimensions = array<i32: 0>} : vector<8x1xi32>
    %3 = vector.broadcast %1 : i32 to vector<8x1xi32>
    %4 = arith.addi %3, %2 : vector<8x1xi32>
    %c8_i32_1 = arith.constant 8 : i32
    %5 = vector.broadcast %c8_i32_1 : i32 to vector<8x1xi32>
    %6 = arith.cmpi slt, %4, %5 : vector<8x1xi32>
    %cst = arith.constant dense<0xFF800000> : vector<8xf32>
    %7 = vector.multi_reduction <maximumf>, %0, %cst [1] : vector<8x32xf32> to vector<8xf32>
    %8 = vector.shape_cast %7 : vector<8xf32> to vector<8x1xf32>
    %9 = vector.broadcast %8 : vector<8x1xf32> to vector<8x32xf32>
    %10 = arith.subf %0, %9 : vector<8x32xf32>
    %11 = math.exp %10 : vector<8x32xf32>
    %cst_2 = arith.constant dense<0.000000e+00> : vector<8xf32>
    %12 = vector.multi_reduction <add>, %11, %cst_2 [1] : vector<8x32xf32> to vector<8xf32>
    %13 = vector.shape_cast %12 : vector<8xf32> to vector<8x1xf32>
    %14 = math.log %13 : vector<8x1xf32>
    %15 = arith.addf %8, %14 : vector<8x1xf32>
    %cst_3 = arith.constant dense<0.000000e+00> : vector<8xf32>
    %16 = vector.multi_reduction <add>, %0, %cst_3 [1] : vector<8x32xf32> to vector<8xf32>
    %17 = vector.shape_cast %16 : vector<8xf32> to vector<8x1xf32>
    %cst_4 = arith.constant 3.200000e+01 : f32
    %18 = vector.broadcast %cst_4 : f32 to vector<8x1xf32>
    %19 = arith.mulf %18, %15 : vector<8x1xf32>
    %20 = arith.subf %19, %17 : vector<8x1xf32>
    %c0_5 = arith.constant 0 : index
    %c0_6 = arith.constant 0 : index
    %21 = vector.load %arg2[%c0_5, %c0_6] : memref<8x1xi32, #tpu.memory_space<vmem>>, vector<8x1xi32>
    %22 = tpu.iota {dimensions = array<i32: 1>} : vector<8x32xi32>
    %23 = vector.broadcast %21 : vector<8x1xi32> to vector<8x32xi32>
    %24 = arith.cmpi eq, %22, %23 : vector<8x32xi32>
    %cst_7 = arith.constant 0.000000e+00 : f32
    %25 = vector.broadcast %cst_7 : f32 to vector<8x32xf32>
    %26 = arith.select %24, %0, %25 : vector<8x32xi1>, vector<8x32xf32>
    %cst_8 = arith.constant dense<0.000000e+00> : vector<8xf32>
    %27 = vector.multi_reduction <add>, %26, %cst_8 [1] : vector<8x32xf32> to vector<8xf32>
    %28 = vector.shape_cast %27 : vector<8xf32> to vector<8x1xf32>
    %29 = arith.subf %15, %28 : vector<8x1xf32>
    %cst_9 = arith.constant 0.000000e+00 : f32
    %30 = vector.broadcast %cst_9 : f32 to vector<8x1xf32>
    %31 = arith.select %6, %20, %30 : vector<8x1xi1>, vector<8x1xf32>
    %32 = vector.shape_cast %31 : vector<8x1xf32> to vector<1x8x1xf32>
    %cst_10 = arith.constant dense<0.000000e+00> : vector<1xf32>
    %33 = vector.multi_reduction <add>, %32, %cst_10 [1, 2] : vector<1x8x1xf32> to vector<1xf32>
    %34 = vector.shape_cast %33 : vector<1xf32> to vector<1x1x1xf32>
    %35 = vector.extract %34[0, 0, 0] : f32 from vector<1x1x1xf32>
    %cst_11 = arith.constant 0.000000e+00 : f32
    %36 = vector.broadcast %cst_11 : f32 to vector<8x1xf32>
    %37 = arith.select %6, %29, %36 : vector<8x1xi1>, vector<8x1xf32>
    %38 = vector.shape_cast %37 : vector<8x1xf32> to vector<1x8x1xf32>
    %cst_12 = arith.constant dense<0.000000e+00> : vector<1xf32>
    %39 = vector.multi_reduction <add>, %38, %cst_12 [1, 2] : vector<1x8x1xf32> to vector<1xf32>
    %40 = vector.shape_cast %39 : vector<1xf32> to vector<1x1x1xf32>
    %41 = vector.extract %40[0, 0, 0] : f32 from vector<1x1x1xf32>
    %42 = tpu.iota {dimensions = array<i32: 1>} : vector<1x8x128xi32>
    %43 = tpu.iota {dimensions = array<i32: 2>} : vector<1x8x128xi32>
    %c0_i32 = arith.constant 0 : i32
    %44 = vector.broadcast %c0_i32 : i32 to vector<1x8x128xi32>
    %45 = arith.cmpi eq, %42, %44 : vector<1x8x128xi32>
    %c0_i32_13 = arith.constant 0 : i32
    %46 = vector.broadcast %c0_i32_13 : i32 to vector<1x8x128xi32>
    %47 = arith.cmpi eq, %43, %46 : vector<1x8x128xi32>
    %48 = arith.andi %45, %47 : vector<1x8x128xi1>
    %c0_i32_14 = arith.constant 0 : i32
    %49 = vector.broadcast %c0_i32_14 : i32 to vector<1x8x128xi32>
    %50 = arith.cmpi eq, %42, %49 : vector<1x8x128xi32>
    %c1_i32 = arith.constant 1 : i32
    %51 = vector.broadcast %c1_i32 : i32 to vector<1x8x128xi32>
    %52 = arith.cmpi eq, %43, %51 : vector<1x8x128xi32>
    %53 = arith.andi %50, %52 : vector<1x8x128xi1>
    %cst_15 = arith.constant 0.000000e+00 : f32
    %54 = vector.broadcast %41 : f32 to vector<1x8x128xf32>
    %55 = vector.broadcast %cst_15 : f32 to vector<1x8x128xf32>
    %56 = arith.select %53, %54, %55 : vector<1x8x128xi1>, vector<1x8x128xf32>
    %57 = vector.broadcast %35 : f32 to vector<1x8x128xf32>
    %58 = arith.select %48, %57, %56 : vector<1x8x128xi1>, vector<1x8x128xf32>
    %c0_16 = arith.constant 0 : index
    %c0_17 = arith.constant 0 : index
    %c0_18 = arith.constant 0 : index
    %59 = vector.load %arg3[%c0_16, %c0_17, %c0_18] : memref<1x8x128xf32, #tpu.memory_space<vmem>>, vector<1x8x128xf32>
    tpu.vector_store %arg3[%c0_16, %c0_17, %c0_18], %58 {strides = array<i32>} : memref<1x8x128xf32, #tpu.memory_space<vmem>>, vector<1x8x128xf32>,
    return
  }
  func.func @transform_0(%arg0: i32) -> (i32, i32) {
    %c0_i32 = arith.constant 0 : i32
    %c0_i32_0 = arith.constant 0 : i32
    return %arg0, %c0_i32 : i32, i32
  }
  func.func @transform_1(%arg0: i32) -> (i32, i32) {
    %c0_i32 = arith.constant 0 : i32
    %c0_i32_0 = arith.constant 0 : i32
    return %arg0, %c0_i32 : i32, i32
  }
  func.func @transform_2(%arg0: i32) -> (i32, i32, i32) {
    %c0_i32 = arith.constant 0 : i32
    %c0_i32_0 = arith.constant 0 : i32
    %c0_i32_1 = arith.constant 0 : i32
    return %arg0, %c0_i32, %c0_i32_0 : i32, i32, i32
  }
}

</mosaic_0001>

<bundles_post_ra>
// kernel: tpu_custom_call.1
= control target key start
LH: loop header
LB: loop body
LE: loop exit
PB: predicated region body
PF: predicated region fallthrough
CT: control target
= control target key end

     0   :  { %vm19_vm0 = vcmask 261120   ;;  %s170_s0 = inlined_call_operand.vmem [shape: f32[8,32], index: 0, kind: input, shape index: {}]   ;;  %s171_s1 = inlined_call_operand.vmem [shape: s32[8,1], index: 1, kind: input, shape index: {}]   ;;  %s172_s2 = inlined_call_operand.hbm [shape: f32[1,8,128], index: 2, kind: output, shape index: {}]  }
   0x1   :  { %v12_v0 = vld [vmem:[%s170_s0] sm:$0xff] }
   0x2   :  { %7 = vsyncpa [#allocation3], 0  ;;  %v20_v1 = vsel %vm19_vm0, %v12_v0, -inf  ;;  %v131_v2 = vmov 0   ;;  %v37_v3 = vld [vmem:[%s171_s1] sm:$0xff]  ;;  %v14_v7 = vlaneseq  ;;  %v32_v12 = vsel %vm19_vm0, %v12_v0, 0.0 }
   0x3   :  { %102 = vset.pattern.permute.xlu0 %v131_v2  ;;  %vm50_vm2 = vcmask 7168   ;;  %s132_s1 = smov [#allocation2]  }
   0x4   :  { %21 = vmax.xlane.f32.xlu0 %v20_v1  ;;  %v39_v8 = vand.u32 127, %v14_v7  ;;  %v15_v40 = vshrl.u32 %v14_v7, 7  ;;  %s88_s13 = sshll.u32 %s132_s1, 4  ;;  %s89_s13 = int_to_ptr.vmem [resolvable:$true] %s88_s13 }
   0x5   :  { %s107_s15 = scalar_lea.vmem %s89_s13, 128  ;;  %p112_p1 = scmp.lt.s32.totalorder %s89_s13, %s89_s13 }
   0x6   :  { %vm72_vm3 = vcmp.eq.s32.totalorder %v15_v40, 0  ;;  %vm75_vm4 = vcmp.eq.s32.totalorder %v39_v8, 1  ;;  %vm73_vm5 = vcmp.eq.s32.totalorder %v39_v8, 0  ;;  %p108_p0 = scmp.ne.s32.totalorder %s89_s13, %s107_s15  ;;  %p113_p2 = scmp.lt.s32.totalorder %s107_s15, %s107_s15 }
   0x7   :  { %vm76_vm6 = vmand %vm72_vm3, %vm75_vm4 }
   0x8   :  { %vm74_vm7 = vmand %vm72_vm3, %vm73_vm5  ;;  %p114_p3 = por %p113_p2, %p112_p1 }
   0xa   :  { %p115_p4 = pnand %p114_p3, %p108_p0 }
  0x1a   :  { %41 = vperm.xlu0 %102, %v37_v3  }
  0x91   :  { %v22_v4 = vpop.xlane.xlu0 %21 }
  0x92   :  { %v23_v5 = vsub.f32 %v12_v0, %v22_v4 }
  0x94   :  { %v24_v6 = vmul.f32 1.442695, %v23_v5 }
  0x96   :  { %103 = vpow2.f32 %v24_v6 }
  0x99   :  { %v42_v9 = vpop.permute.xlu0 %41 }
  0x9a   :  { %vm43_vm1 = vcmp.eq.s32.totalorder %v39_v8, %v42_v9 }
  0x9b   :  { %v44_v13 = vsel %vm43_vm1, %v12_v0, 0.0 }
  0x9c   :  { %v45_v14 = vsel %vm19_vm0, %v44_v13, 0.0 }
  0xa0   :  { %v104_v10 = vpop.eup %103 }
  0xa1   :  { %v26_v11 = vsel %vm19_vm0, %v104_v10, 0.0 }
  0xa2   :  { %27 = vadd.xlane.f32.xlu1 %v26_v11 }
  0xa6   :  { %33 = vadd.xlane.f32.xlu1 %v32_v12 }
  0xaa   :  { %46 = vadd.xlane.f32.xlu1 %v45_v14 }
 0x12f   :  { %v28_v15 = vpop.xlane.xlu1 %27 }
 0x130   :  { %105 = vlog2.f32 %v28_v15 }
 0x133   :  { %v34_v17 = vpop.xlane.xlu1 %33 }
 0x137   :  { %v47_v21 = vpop.xlane.xlu1 %46 }
 0x13a   :  { %v106_v16 = vpop.eup %105 }
 0x13b   :  { %v30_v18 = vmul.f32 0.6931472, %v106_v16 }
 0x13d   :  { %v31_v19 = vadd.f32 %v30_v18, %v22_v4 }
 0x13f   :  { %v35_v20 = vmul.f32 32.0, %v31_v19  ;;  %v48_v23 = vsub.f32 %v31_v19, %v47_v21 }
 0x141   :  { %v36_v22 = vsub.f32 %v35_v20, %v34_v17  ;;  %v62_v25 = vsel %vm50_vm2, %v48_v23, 0.0 }
 0x143   :  { %v51_v24 = vsel %vm50_vm2, %v36_v22, 0.0 }
 0x144   :  { %52 = vadd.xlane.f32.xlu1 %v51_v24 }
 0x148   :  { %63 = vadd.xlane.f32.xlu1 %v62_v25 }
 0x1d1   :  { %v53_v26 = vpop.xlane.xlu1 %52 }
 0x1d2   :  { %v54_v27 = vrot.slane %v53_v26, 4 }
 0x1d4   :  { %v55_v28 = vadd.f32 %v54_v27, %v53_v26 }
 0x1d5   :  { %v64_v29 = vpop.xlane.xlu1 %63 }
 0x1d6   :  { %v56_v30 = vrot.slane %v55_v28, 2  ;;  %v65_v31 = vrot.slane %v64_v29, 4 }
 0x1d8   :  { %v66_v32 = vadd.f32 %v65_v31, %v64_v29  ;;  %v57_v33 = vadd.f32 %v56_v30, %v55_v28 }
 0x1da   :  { %v67_v34 = vrot.slane %v66_v32, 2  ;;  %v58_v35 = vrot.slane %v57_v33, 1 }
 0x1dc   :  { %v68_v36 = vadd.f32 %v67_v34, %v66_v32  ;;  %v59_v37 = vadd.f32 %v58_v35, %v57_v33 }
 0x1de   :  { %96 = vpush %v59_v37  ;;  %v69_v38 = vrot.slane %v68_v36, 1 }
 0x1e0   :  { %v70_v39 = vadd.f32 %v69_v38, %v68_v36 }
 0x1e2   :  { %98 = vpush %v70_v39 }
 0x20f   :  { %s97_s0 = spop %96 }
 0x210   :  { %v79_v42 = vstv %s97_s0 }
 0x213   :  { %s99_s14 = spop %98 }
 0x214   :  { %v77_v41 = vstv %s99_s14 }
 0x215   :  { %v78_v43 = vsel %vm76_vm6, %v77_v41, 0.0 }
 0x216   :  { %v80_v44 = vsel %vm74_vm7, %v79_v42, %v78_v43 }
 0x217   :  { %81 = vst [vmem:[#allocation2] sm:$0xff] %v80_v44 }
 0x218   :  { %118 = shalt.err (!%p115_p4)
}
 0x219   :  { %s119_s18 = scalar_lea.hbm %s172_s2, 128 }
 0x21a   :  { %p120_p5 = scmp.ne.s32.totalorder %s172_s2, %s119_s18  ;;  %p123_p6 = scmp.lt.u32.totalorder %s119_s18, %s172_s2 }
 0x21c   :  { %p125_p7 = pnand %p123_p6, %p120_p5 }
 0x21e   :  { %128 = shalt.err (!%p125_p7)
}
 0x21f   :  { %91 = dma.vmem_to_hbm [thread:$0]  %s89_s13, 128, %s172_s2, [#allocation3]  }
 0x220   :  { %129 = dma.done.wait [#allocation3], 128  }
 0x221   :  { %130 = vsyncadd [#allocation3], 4294967168 }
 0x222   :  { %95 = vsyncpa [#allocation3], 1 }

</bundles_post_ra>
